<compile_context>
chip_gen: v7x
topology: tpu7x:2x2x1
jax: 0.10.0
libtpu: 0.0.40
codegen_flags: <defaults>
</compile_context>

<pallas_src>
import jax
import jax.numpy as jnp
from jax import lax
from jax.experimental import pallas as pl
from jax.experimental.pallas import tpu as pltpu


def _round_up(x, m):
    return ((x + m - 1) // m) * m


def mlm_kernel(ids_ref, table_ref, wt_ref, b_ref, out_ref):
    """One (token_tile, vocab_tile) tile of logits = Emb(X) @ W.T + b.

    ids_ref  : (tm, 1)  int32    token ids of this token tile
    table_ref: (V, E)   bf16     whole embedding table (grid-invariant; demo-only)
    wt_ref   : (E, tv)  bf16     vocab tile of W.T (vocab padded to 128 lanes)
    b_ref    : (1, tv)  f32      vocab tile of bias
    out_ref  : (tm, tv) f32      lane-dense logits tile
    """
    tm = ids_ref.shape[0]
    v_rows = table_ref.shape[0]

    # Batched gather as a one-hot matmul on the MXU.  Exact: each row of the
    # one-hot has a single 1.0, so emb is exactly the bf16 table row.
    ids = ids_ref[...]                                            # (tm, 1)
    iota = lax.broadcasted_iota(jnp.int32, (tm, v_rows), 1)       # (tm, V)
    onehot = (ids == iota).astype(table_ref.dtype)                # (tm, V) bf16
    emb = jnp.dot(onehot, table_ref[...],
                  preferred_element_type=jnp.float32)             # (tm, E) f32

    # Projection: bf16 operands, f32 MXU accumulation, full-lane output store.
    out_ref[...] = (
        jnp.dot(emb.astype(wt_ref.dtype), wt_ref[...],
                preferred_element_type=jnp.float32)
        + b_ref[...]
    ).astype(out_ref.dtype)


def mlm_forward(X, emb_table, lin_w, lin_b, *, token_tile=256, vocab_tile=512):
    """X: (B, T) int ids. emb_table: (V, E). lin_w: (V, E) (nn.Linear layout). lin_b: (V,)."""
    B, T = X.shape
    V, E = emb_table.shape
    N = B * T

    # Don't pad tiny batches up to 128/256 rows (f32 sublane constraint is 8);
    # vocab padded to a multiple of 128 so every store is a full-lane store.
    tm = min(token_tile, _round_up(N, 8))
    tv = min(vocab_tile, _round_up(V, 128))
    n_tok = pl.cdiv(N, tm)
    n_voc = pl.cdiv(V, tv)
    Np, Vp = n_tok * tm, n_voc * tv

    ids = jnp.pad(X.reshape(-1).astype(jnp.int32), (0, Np - N)).reshape(Np, 1)
    table = emb_table.astype(jnp.bfloat16)
    wt = jnp.pad(lin_w.T.astype(jnp.bfloat16), ((0, 0), (0, Vp - V)))
    b2 = jnp.pad(lin_b.astype(jnp.float32), (0, Vp - V)).reshape(1, Vp)

    # Vocab axis OUTERMOST, token axis innermost: each W.T tile is fetched
    # from HBM exactly once; the (tiny) ids / emb work is redone per step.
    grid = (n_voc, n_tok)

    out_flat = pl.pallas_call(
        mlm_kernel,
        out_shape=jax.ShapeDtypeStruct((Np, Vp), jnp.float32),
        grid_spec=pltpu.PrefetchScalarGridSpec(
            num_scalar_prefetch=0,
            grid=grid,
            in_specs=[
                # Token ids for this token tile.
                pl.BlockSpec((tm, 1), lambda j, i: (i, 0)),
                # Whole embedding table, grid-invariant (demo-only; see TODO
                # above for the production HBM DMA-gather path).
                pl.BlockSpec((V, E), lambda j, i: (0, 0)),
                # Vocab tiles of W.T and bias.
                pl.BlockSpec((E, tv), lambda j, i: (0, j)),
                pl.BlockSpec((1, tv), lambda j, i: (0, j)),
            ],
            out_specs=pl.BlockSpec((tm, tv), lambda j, i: (i, j)),
        ),
        compiler_params=pltpu.CompilerParams(
            # No cross-step state -> both axes independent; the vocab axis is
            # the big one, so megacore (v7x) can split it across TensorCores.
            dimension_semantics=("parallel", "parallel"),
            vmem_limit_bytes=32 * 1024 * 1024,
        ),
    )(ids, table, wt, b2)

    return out_flat[:N, :V].reshape(B, T, V)


if __name__ == "__main__":
    # Small shapes consistent with the module (n_embd from the spec, tiny vocab).
    vocab_size = 30           # len(chars) + 2 for a tiny charset
    n_embd = 384
    B, T = 2, 8

    key = jax.random.PRNGKey(0)
    k_emb, k_w, k_b, k_x = jax.random.split(key, 4)

    # Snap parameters to bf16-representable values so the correctness check is
    # tight regardless of MXU precision mode / bf16 operand feeding.
    def snap(x):
        return x.astype(jnp.bfloat16).astype(jnp.float32)

    emb_table = snap(jax.random.normal(k_emb, (vocab_size, n_embd), dtype=jnp.float32))
    bound = 1.0 / (n_embd ** 0.5)
    lin_w = snap(jax.random.uniform(k_w, (vocab_size, n_embd), jnp.float32, -bound, bound))
    lin_b = snap(jax.random.uniform(k_b, (vocab_size,), jnp.float32, -bound, bound))

    X = jax.random.randint(k_x, (B, T), 0, vocab_size, dtype=jnp.int32)

    logits = mlm_forward(X, emb_table, lin_w, lin_b)
    logits = jax.block_until_ready(logits)

    # Reference: embedding gather + linear in plain JAX.
    ref = jnp.take(emb_table, X, axis=0) @ lin_w.T + lin_b
    assert logits.shape == (B, T, vocab_size)
    assert jnp.allclose(logits, ref, atol=1e-4, rtol=1e-4), float(
        jnp.max(jnp.abs(logits - ref))
    )

    print("KERNEL_OK")
</pallas_src>

<mosaic_0001>
module attributes {stable_mosaic.version = 11 : i64} {
  func.func @mlm_kernel(%arg0: i32, %arg1: i32, %arg2: memref<16x1xi32, #tpu.memory_space<vmem>>, %arg3: memref<30x384xbf16, #tpu.memory_space<vmem>>, %arg4: memref<384x128xbf16, #tpu.memory_space<vmem>>, %arg5: memref<1x128xf32, #tpu.memory_space<vmem>>, %arg6: memref<16x128xf32, #tpu.memory_space<vmem>>) attributes {dimension_semantics = [#tpu.dimension_semantics<parallel>, #tpu.dimension_semantics<parallel>], iteration_bounds = array<i64: 1, 1>, scalar_prefetch = 0 : i64, scratch_operands = 0 : i64, tpu.core_type = #tpu.core_type<tc>, window_params = [{transform_indices = @transform_0, window_bounds = array<i64: 16, 1>}, {pipeline_mode = #tpu.pipeline_mode<synchronous>, transform_indices = @transform_1, window_bounds = array<i64: 30, 384>}, {transform_indices = @transform_2, window_bounds = array<i64: 384, 128>}, {transform_indices = @transform_3, window_bounds = array<i64: 1, 128>}, {transform_indices = @transform_4, window_bounds = array<i64: 16, 128>}]} {
    %c0 = arith.constant 0 : index
    %c0_0 = arith.constant 0 : index
    %0 = vector.load %arg2[%c0, %c0_0] : memref<16x1xi32, #tpu.memory_space<vmem>>, vector<16x1xi32>
    %1 = tpu.iota {dimensions = array<i32: 1>} : vector<16x30xi32>
    %2 = vector.broadcast %0 : vector<16x1xi32> to vector<16x30xi32>
    %3 = arith.cmpi eq, %2, %1 : vector<16x30xi32>
    %4 = arith.extui %3 : vector<16x30xi1> to vector<16x30xi32>
    %5 = arith.sitofp %4 : vector<16x30xi32> to vector<16x30xf32>
    %6 = arith.truncf %5 : vector<16x30xf32> to vector<16x30xbf16>
    %c0_1 = arith.constant 0 : index
    %c0_2 = arith.constant 0 : index
    %7 = vector.load %arg3[%c0_1, %c0_2] : memref<30x384xbf16, #tpu.memory_space<vmem>>, vector<30x384xbf16>
    %cst = arith.constant dense<0.000000e+00> : vector<16x384xf32>
    %8 = tpu.matmul %6, %7, %cst {dimension_numbers = #tpu.dot_dimension_numbers<[1], [0], [0], [1], [0, 0, 1, 1], [], []>} : vector<16x30xbf16>, vector<30x384xbf16>, vector<16x384xf32> -> vector<16x384xf32>
    %9 = arith.truncf %8 : vector<16x384xf32> to vector<16x384xbf16>
    %c0_3 = arith.constant 0 : index
    %c0_4 = arith.constant 0 : index
    %10 = vector.load %arg4[%c0_3, %c0_4] : memref<384x128xbf16, #tpu.memory_space<vmem>>, vector<384x128xbf16>
    %cst_5 = arith.constant dense<0.000000e+00> : vector<16x128xf32>
    %11 = tpu.matmul %9, %10, %cst_5 {dimension_numbers = #tpu.dot_dimension_numbers<[1], [0], [0], [1], [0, 0, 1, 1], [], []>} : vector<16x384xbf16>, vector<384x128xbf16>, vector<16x128xf32> -> vector<16x128xf32>
    %c0_6 = arith.constant 0 : index
    %c0_7 = arith.constant 0 : index
    %12 = vector.load %arg5[%c0_6, %c0_7] : memref<1x128xf32, #tpu.memory_space<vmem>>, vector<1x128xf32>
    %13 = vector.broadcast %12 : vector<1x128xf32> to vector<16x128xf32>
    %14 = arith.addf %11, %13 : vector<16x128xf32>
    %c0_8 = arith.constant 0 : index
    %c0_9 = arith.constant 0 : index
    %15 = vector.load %arg6[%c0_8, %c0_9] : memref<16x128xf32, #tpu.memory_space<vmem>>, vector<16x128xf32>
    tpu.vector_store %arg6[%c0_8, %c0_9], %14 {strides = array<i32>} : memref<16x128xf32, #tpu.memory_space<vmem>>, vector<16x128xf32>,
    return
  }
  func.func @transform_0(%arg0: i32, %arg1: i32) -> (i32, i32) {
    %c0_i32 = arith.constant 0 : i32
    %c0_i32_0 = arith.constant 0 : i32
    return %arg1, %c0_i32 : i32, i32
  }
  func.func @transform_1(%arg0: i32, %arg1: i32) -> (i32, i32) {
    %c0_i32 = arith.constant 0 : i32
    %c0_i32_0 = arith.constant 0 : i32
    %c0_i32_1 = arith.constant 0 : i32
    return %c0_i32, %c0_i32_0 : i32, i32
  }
  func.func @transform_2(%arg0: i32, %arg1: i32) -> (i32, i32) {
    %c0_i32 = arith.constant 0 : i32
    %c0_i32_0 = arith.constant 0 : i32
    return %c0_i32, %arg0 : i32, i32
  }
  func.func @transform_3(%arg0: i32, %arg1: i32) -> (i32, i32) {
    %c0_i32 = arith.constant 0 : i32
    %c0_i32_0 = arith.constant 0 : i32
    return %c0_i32, %arg0 : i32, i32
  }
  func.func @transform_4(%arg0: i32, %arg1: i32) -> (i32, i32) {
    %c0_i32 = arith.constant 0 : i32
    return %arg1, %arg0 : i32, i32
  }
}

</mosaic_0001>

<bundles_post_ra>
// kernel: tpu_custom_call.1
= control target key start
LH: loop header
LB: loop body
LE: loop exit
PB: predicated region body
PF: predicated region fallthrough
CT: control target
= control target key end

     0   :  { %9 = vsyncpa [#allocation3], 0  ;;  %s816_s0 = inlined_call_operand.vmem [shape: s32[16,1], index: 0, kind: input, shape index: {}]   ;;  %s817_s1 = inlined_call_operand.hbm [shape: bf16[30,384], index: 1, kind: input, shape index: {}]   ;;  %s818_s2 = inlined_call_operand.hbm [shape: bf16[384,128], index: 2, kind: input, shape index: {}]   ;;  %s819_s3 = inlined_call_operand.vmem [shape: f32[1,128], index: 3, kind: input, shape index: {}]   ;;  %s820_s4 = inlined_call_operand.hbm [shape: f32[16,128], index: 4, kind: output, shape index: {}]  }
   0x1   :  { %10 = vsyncpa [#allocation6], 0 }
   0x2   :  { %11 = vsyncpa [#allocation4], 0  ;;  %s718_s15 = smov [#allocation2]   ;;  %s646_s19 = scalar_lea.hbm %s817_s1, 768 }
   0x3   :  { %s19_s16 = sshll.u32 %s718_s15, 4  ;;  %p647_p0 = scmp.ne.s32.totalorder %s817_s1, %s646_s19  ;;  %s20_s16 = int_to_ptr.vmem [resolvable:$true] %s19_s16 }
   0x4   :  { %p650_p1 = scmp.lt.u32.totalorder %s646_s19, %s817_s1 }
   0x6   :  { %p652_p2 = pnand %p650_p1, %p647_p0 }
   0x8   :  { %655 = shalt.err (!%p652_p2)
}
   0x9   :  { %s656_s24 = scalar_lea.vmem %s20_s16, 768  ;;  %p661_p4 = scmp.lt.s32.totalorder %s20_s16, %s20_s16 }
   0xa   :  { %p657_p3 = scmp.ne.s32.totalorder %s20_s16, %s656_s24  ;;  %p662_p5 = scmp.lt.s32.totalorder %s656_s24, %s656_s24 }
   0xc   :  { %p663_p6 = por %p662_p5, %p661_p4 }
   0xe   :  { %p664_p7 = pnand %p663_p6, %p657_p3 }
  0x10   :  { %667 = shalt.err (!%p664_p7)
}
  0x11   :  { %s719_s25 = smov 192   ;;  %s720_s26 = smov 12  }
  0x12   :  { %25 = dma.hbm_to_vmem [thread:$0]  %s817_s1, 768, %s20_s16, [#allocation3], %s719_s25, %s719_s25, %s720_s26  }
  0x13   :  { %s721_s29 = smov [#allocation5]   ;;  %s668_s7 = scalar_lea.hbm %s818_s2, 3072 }
  0x14   :  { %s31_s30 = sshll.u32 %s721_s29, 4  ;;  %p669_p8 = scmp.ne.s32.totalorder %s818_s2, %s668_s7  ;;  %s32_s30 = int_to_ptr.vmem [resolvable:$true] %s31_s30 }
  0x15   :  { %p672_p9 = scmp.lt.u32.totalorder %s668_s7, %s818_s2 }
  0x17   :  { %p674_p10 = pnand %p672_p9, %p669_p8 }
  0x19   :  { %677 = shalt.err (!%p674_p10)
}
  0x1a   :  { %s678_s12 = scalar_lea.vmem %s32_s30, 3072  ;;  %p683_p12 = scmp.lt.s32.totalorder %s32_s30, %s32_s30 }
  0x1b   :  { %p679_p11 = scmp.ne.s32.totalorder %s32_s30, %s678_s12  ;;  %p684_p13 = scmp.lt.s32.totalorder %s678_s12, %s678_s12 }
  0x1d   :  { %p685_p0 = por %p684_p13, %p683_p12 }
  0x1f   :  { %p686_p1 = pnand %p685_p0, %p679_p11 }
  0x21   :  { %689 = shalt.err (!%p686_p1)
}
  0x22   :  { %s722_s1 = smov 64   ;;  %s723_s13 = smov 4  }
  0x23   :  { %37 = dma.hbm_to_vmem [thread:$0]  %s818_s2, 3072, %s32_s30, [#allocation6], %s722_s1, %s722_s1, %s723_s13  }
  0x24   :  { %712 = dma.done.wait [#allocation3], 768  }
  0x25   :  { %713 = vsyncadd [#allocation3], 4294966528 }
  0x26   :  { %714 = dma.done.wait [#allocation6], 3072  }
  0x27   :  { %715 = vsyncadd [#allocation6], 4294964224  ;;  %v724_v0 = vmov 0   ;;  %v725_v1 = vmov 0.0   ;;  %v47_v2 = vld [vmem:[%s816_s0] sm:$0xff]  ;;  %v48_v3 = vld [vmem:[%s816_s0 + $0x8] sm:$0xff]  ;;  %v49_v13 = vlaneseq }
  0x28   :  { %613 = vset.pattern.permute.xlu0 %v724_v0  ;;  %573 = vmatprep.subr.bf16.mxu1 %v725_v1  ;;  %v614_v4 = vld [vmem:[#allocation2 + $0x4] ss:$12 sps:$4 sm:$0xff]   ;;  %v616_v5 = vld [vmem:[#allocation2] ss:$12 sps:$4 sm:$0xff]   ;;  %v617_v6 = vld [vmem:[#allocation2 + $0x8] ss:$12 sps:$4 sm:$0xff]  }
  0x29   :  { %147 = vmatprep.mubr.bf16.mxu0 %v724_v0  ;;  %52 = vperm.xlu0 %613, %v47_v2   ;;  %v618_v7 = vld [vmem:[#allocation2 + $0x1c] ss:$12 sps:$4 sm:$0x7f]   ;;  %vm105_vm0 = vcmask 1046528   ;;  %vm726_vm1 = vmmov 0   ;;  %v623_v12 = vld [vmem:[#allocation5 + $0x40] sm:$0xff]  }
  0x2a   :  { %115 = vmatprep.subr.bf16.mxu0 %v614_v4  ;;  %574 = vmatpush3.bf16.msra.mxu1 %v617_v6  ;;  %v620_v8 = vld [vmem:[#allocation2 + $0x18] ss:$12 sps:$4 sm:$0x7f]   ;;  %v621_v9 = vld [vmem:[#allocation2 + $0x20] ss:$12 sps:$4 sm:$0x7f]  }
  0x2b   :  { %116 = vmatpush1.bf16.msra.mxu0 %v616_v5  ;;  %575 = vmatprep.subr.bf16.mxu1 %v725_v1  ;;  %v107_v10 = vsel %vm105_vm0, %v620_v8, 0  ;;  %v113_v11 = vsel %vm105_vm0, %v621_v9, 0  ;;  %v50_v14 = vand.u32 127, %v49_v13  ;;  %vm101_vm4 = vcmask 244736   ;;  %v622_v19 = vld [vmem:[#allocation5 + $0x80] sm:$0xff]   ;;  %v626_v22 = vld [vmem:[#allocation5 + $0x48] sm:$0xff]  }
  0x2c   :  { %511 = vmatprep.subr.msk.bf16.mxu0 %vm105_vm0, %v618_v7  ;;  %577 = vmatprep.mubr.msk.bf16.mxu1 %vm726_vm1, %v725_v1  ;;  %v624_v20 = vld [vmem:[#allocation5] sm:$0xff]   ;;  %v625_v23 = vld [vmem:[#allocation5 + $0x88] sm:$0xff]   ;;  %v629_v25 = vld [vmem:[#allocation5 + $0x50] sm:$0xff]   ;;  %s727_s20 = smov [#allocation7]  }
  0x2d   :  { %55 = vperm.xlu0 %613, %v48_v3   ;;  %v627_v24 = vld [vmem:[#allocation5 + $0x8] sm:$0xff]   ;;  %v628_v26 = vld [vmem:[#allocation5 + $0x90] sm:$0xff]   ;;  %v632_v28 = vld [vmem:[#allocation5 + $0x58] sm:$0xff]   ;;  %s490_s21 = sshll.u32 %s727_s20, 4  ;;  %s491_s21 = int_to_ptr.vmem [resolvable:$true] %s490_s21 }
  0x2e   :  { %576 = vmatpush3.bf16.msra.mxu1 %v113_v11  ;;  %v630_v27 = vld [vmem:[#allocation5 + $0x10] sm:$0xff]   ;;  %v631_v29 = vld [vmem:[#allocation5 + $0x98] sm:$0xff]   ;;  %v635_v31 = vld [vmem:[#allocation5 + $0x60] sm:$0xff]   ;;  %s690_s22 = scalar_lea.vmem %s491_s21, 256  ;;  %p695_p3 = scmp.lt.s32.totalorder %s491_s21, %s491_s21 }
  0x2f   :  { %118 = vmatpush1.bf16.msra.mxu0 %v107_v10  ;;  %581 = vmatprep.subr.bf16.mxu1 %v725_v1  ;;  %v633_v30 = vld [vmem:[#allocation5 + $0x18] sm:$0xff]   ;;  %v634_v32 = vld [vmem:[#allocation5 + $0xa0] sm:$0xff]   ;;  %v638_v34 = vld [vmem:[#allocation5 + $0x68] sm:$0xff]   ;;  %p691_p2 = scmp.ne.s32.totalorder %s491_s21, %s690_s22  ;;  %p696_p4 = scmp.lt.s32.totalorder %s690_s22, %s690_s22 }
  0x30   :  { %542 = vmatprep.subr.bf16.mxu0 %v623_v12  ;;  %v636_v33 = vld [vmem:[#allocation5 + $0x20] sm:$0xff]   ;;  %v637_v35 = vld [vmem:[#allocation5 + $0xa8] sm:$0xff]   ;;  %v641_v37 = vld [vmem:[#allocation5 + $0x70] sm:$0xff]  }
  0x31   :  { %v639_v36 = vld [vmem:[#allocation5 + $0x28] sm:$0xff]   ;;  %v640_v38 = vld [vmem:[#allocation5 + $0xb0] sm:$0xff]   ;;  %v643_v40 = vld [vmem:[#allocation5 + $0xb8] sm:$0xff]   ;;  %p697_p5 = por %p696_p4, %p695_p3 }
  0x32   :  { %v642_v39 = vld [vmem:[#allocation5 + $0x30] sm:$0xff]   ;;  %v644_v41 = vld [vmem:[#allocation5 + $0x78] sm:$0xff]  }
  0x33   :  { %v645_v42 = vld [vmem:[#allocation5 + $0x38] sm:$0xff]   ;;  %p698_p6 = pnand %p697_p5, %p691_p2 }
  0x34   :  { %v514_v58 = vld [vmem:[%s819_s3] ss:$0 sm:$0xff] }
  0xa8   :  { %v53_v15 = vpop.permute.xlu0 %52 }
  0xa9   :  { %vm57_vm2 = vcmp.eq.s32.totalorder %v53_v15, %v50_v14 }
  0xaa   :  { %v503_v17 = vsel %vm57_vm2, 1.0, %v725_v1 }
  0xac   :  { %v56_v16 = vpop.permute.xlu0 %55 }
  0xad   :  { %vm58_vm3 = vcmp.eq.s32.totalorder %v56_v16, %v50_v14 }
  0xae   :  { %v504_v18 = vsel %vm58_vm3, 1.0, %v725_v1 }
  0xaf   :  { %v63_v21 = vpack.c.bf16 %v504_v18, %v503_v17 }
  0xb1   :  { %512 = vmatmul.mubr.msk.bf16.vlgmr.msra.gmra.mrb[0].mxu0 %vm101_vm4, %v63_v21  ;;  %578 = vmatmul.mubr.msk.bf16.vlgmr.msra.gmra.mrb[0].mxu1 %vm101_vm4, %v63_v21 }
  0xb2   :  { %582 = vmatpush3.bf16.msra.mxu1 %v622_v19  ;;  %543 = vmatpush3.bf16.msra.mxu0 %v624_v20 }
  0xb3   :  { %583 = vmatprep.subr.bf16.mxu1 %v725_v1  ;;  %544 = vmatprep.subr.bf16.mxu0 %v626_v22 }
  0xb4   :  { %597 = vmatprep.mubr.msk.bf16.mxu1 %vm726_vm1, %v725_v1 }
  0xb6   :  { %584 = vmatpush3.bf16.msra.mxu1 %v625_v23  ;;  %545 = vmatpush3.bf16.msra.mxu0 %v627_v24 }
  0xb7   :  { %585 = vmatprep.subr.bf16.mxu1 %v725_v1  ;;  %546 = vmatprep.subr.bf16.mxu0 %v629_v25 }
  0xba   :  { %586 = vmatpush3.bf16.msra.mxu1 %v628_v26  ;;  %547 = vmatpush3.bf16.msra.mxu0 %v630_v27 }
  0xbb   :  { %587 = vmatprep.subr.bf16.mxu1 %v725_v1  ;;  %548 = vmatprep.subr.bf16.mxu0 %v632_v28 }
  0xbe   :  { %588 = vmatpush3.bf16.msra.mxu1 %v631_v29  ;;  %549 = vmatpush3.bf16.msra.mxu0 %v633_v30 }
  0xbf   :  { %589 = vmatprep.subr.bf16.mxu1 %v725_v1  ;;  %550 = vmatprep.subr.bf16.mxu0 %v635_v31 }
  0xc2   :  { %590 = vmatpush3.bf16.msra.mxu1 %v634_v32  ;;  %551 = vmatpush3.bf16.msra.mxu0 %v636_v33 }
  0xc3   :  { %591 = vmatprep.subr.bf16.mxu1 %v725_v1  ;;  %552 = vmatprep.subr.bf16.mxu0 %v638_v34 }
  0xc6   :  { %592 = vmatpush3.bf16.msra.mxu1 %v637_v35  ;;  %553 = vmatpush3.bf16.msra.mxu0 %v639_v36 }
  0xc7   :  { %593 = vmatprep.subr.bf16.mxu1 %v725_v1  ;;  %554 = vmatprep.subr.bf16.mxu0 %v641_v37 }
  0xca   :  { %594 = vmatpush3.bf16.msra.mxu1 %v640_v38  ;;  %555 = vmatpush3.bf16.msra.mxu0 %v642_v39 }
  0xcb   :  { %595 = vmatprep.subr.bf16.mxu1 %v725_v1  ;;  %556 = vmatprep.subr.bf16.mxu0 %v644_v41 }
  0xce   :  { %596 = vmatpush3.bf16.msra.mxu1 %v643_v40  ;;  %557 = vmatpush3.bf16.msra.mxu0 %v645_v42 }
 0x184   :  { %v149_v43 = vpop.f32.mrb[0].mxu0  ;;  %v192_v44 = vpop.f32.mrb[0].mxu1 }
 0x185   :  { %v151_v45 = vpop.f32.mrb[1].mxu0  ;;  %v579_v46 = vpop.f32.mrb[1].mxu1 }
 0x186   :  { %v153_v47 = vpop.f32.mrb[2].mxu0  ;;  %v195_v48 = vpop.f32.mrb[2].mxu1 }
 0x187   :  { %v199_v49 = vpack.c.bf16 %v153_v47, %v149_v43  ;;  %v201_v50 = vpack.c.bf16 %v195_v48, %v192_v44  ;;  %v155_v51 = vpop.f32.mrb[3].mxu0  ;;  %v580_v52 = vpop.f32.mrb[3].mxu1 }
 0x188   :  { %v200_v53 = vpack.c.bf16 %v155_v51, %v151_v45 }
 0x189   :  { %598 = vmatmul.mubr.bf16.vlgmr.msra.gmra.mrb[4].mxu1 %v201_v50 }
 0x18a   :  { %433 = vmatprep.mubr.bf16.mxu0 %v200_v53 }
 0x18b   :  { %434 = vmatmul.mubr.bf16.vlgmr.msra.gmra.mrb[4].mxu0 %v199_v49 }
 0x25c   :  { %v476_v54 = vpop.f32.mrb[4].mxu1 }
 0x25d   :  { %v599_v55 = vpop.f32.mrb[5].mxu1 }
 0x25e   :  { %v558_v56 = vpop.f32.mrb[4].mxu0  ;;  %v479_v57 = vpop.f32.mrb[6].mxu1 }
 0x25f   :  { %v559_v59 = vpop.f32.mrb[5].mxu0  ;;  %v600_v60 = vpop.f32.mrb[7].mxu1 }
 0x260   :  { %v560_v61 = vadd.f32 %v559_v59, %v558_v56  ;;  %v561_v62 = vpop.f32.mrb[6].mxu0 }
 0x261   :  { %v562_v63 = vpop.f32.mrb[7].mxu0 }
 0x262   :  { %v436_v0 = vadd.f32 %v560_v61, %v514_v58  ;;  %v563_v1 = vadd.f32 %v562_v63, %v561_v62 }
 0x264   :  { %v477_v2 = vadd.f32 %v476_v54, %v436_v0  ;;  %v439_v3 = vadd.f32 %v563_v1, %v514_v58 }
 0x266   :  { %483 = vst [vmem:[#allocation7] sm:$0xff] %v477_v2  ;;  %v480_v4 = vadd.f32 %v479_v57, %v439_v3 }
 0x268   :  { %484 = vst [vmem:[#allocation7 + $0x8] sm:$0xff] %v480_v4 }
 0x269   :  { %701 = shalt.err (!%p698_p6)
}
 0x26a   :  { %s702_s24 = scalar_lea.hbm %s820_s4, 256 }
 0x26b   :  { %p703_p7 = scmp.ne.s32.totalorder %s820_s4, %s702_s24  ;;  %p706_p8 = scmp.lt.u32.totalorder %s702_s24, %s820_s4 }
 0x26d   :  { %p708_p9 = pnand %p706_p8, %p703_p7 }
 0x26f   :  { %711 = shalt.err (!%p708_p9)
}
 0x270   :  { %s728_s29 = smov 128   ;;  %s729_s30 = smov 8  }
 0x271   :  { %496 = dma.vmem_to_hbm [thread:$0]  %s491_s21, 256, %s820_s4, [#allocation4], %s728_s29, %s728_s29, %s729_s30  }
 0x272   :  { %716 = dma.done.wait [#allocation4], 256  }
 0x273   :  { %717 = vsyncadd [#allocation4], 4294967040 }
 0x274   :  { %500 = vsyncpa [#allocation3], 1 }
 0x275   :  { %501 = vsyncpa [#allocation6], 1 }
 0x276   :  { %502 = vsyncpa [#allocation4], 1 }

</bundles_post_ra>
